<compile_context>
chip_gen: v6e
topology: v6e:2x2x1
jax: 0.10.0
libtpu: 0.0.40
codegen_flags: <defaults>
</compile_context>

<pallas_src>
import functools

import jax
import jax.numpy as jnp
from jax.experimental import pallas as pl
from jax.experimental.pallas import tpu as pltpu

_LANE = 128


def _round_up(n, m):
    return ((n + m - 1) // m) * m


def _pad2d(a, rows, cols, dtype):
    r, c = a.shape
    return jnp.pad(a.astype(dtype), ((0, rows - r), (0, cols - c)))


@functools.lru_cache(maxsize=None)
def _tpu_config():
    """Per-generation (vmem_limit_bytes, fused-path padded-node threshold)."""
    try:
        vmem = int(pltpu.get_tpu_info().vmem_capacity_bytes)
    except Exception:                                     # pragma: no cover
        vmem = 64 * 1024 * 1024
    vmem_limit = min(vmem * 3 // 4, 96 * 1024 * 1024)
    # v5e/v6e (128 MiB VMEM, 1 TensorCore): keep A_hat resident for graphs up
    # to 2048 padded nodes and reuse it across all 3 layers.  v7x (64 MiB,
    # 2 TensorCores): keep the threshold at 1024 so mid-size graphs hit the
    # tiled path whose "parallel" row axis feeds both cores.
    fuse_max = 2048 if vmem >= 100 * 1024 * 1024 else 1024
    return vmem_limit, fuse_max


# ---------------------------------------------------------------------------
# Fused 3-layer kernel (small graphs): one pallas_call, no intermediate HBM.
# ---------------------------------------------------------------------------
def _gcn_fused_kernel(a_ref, x_ref, w1_ref, b1_ref, w2_ref, b2_ref,
                      w3_ref, b3_ref, o_ref, *, num_classes):
    a = a_ref[...]                       # bf16 [Np, Np] normalized adjacency
    # TODO(synk): A_hat could be streamed via pltpu.emit_pipeline to overlap
    # its DMA with the X@W1 matmul; kept resident here for simplicity.

    # layer 1: relu(A @ (X @ W1) + b1); bf16 MXU inputs, f32 accumulate.
    h = jnp.dot(x_ref[...], w1_ref[...], preferred_element_type=jnp.float32)
    h = jnp.dot(a, h.astype(a.dtype), preferred_element_type=jnp.float32)
    h = jnp.maximum(h + b1_ref[...], 0.0).astype(a.dtype)
    # TODO(synk): F.dropout(training=self.training) applied as identity (eval).

    # layer 2
    h = jnp.dot(h, w2_ref[...], preferred_element_type=jnp.float32)
    h = jnp.dot(a, h.astype(a.dtype), preferred_element_type=jnp.float32)
    h = jnp.maximum(h + b2_ref[...], 0.0).astype(a.dtype)

    # layer 3 + log_softmax masked to the valid (unpadded) class columns.
    z = jnp.dot(h, w3_ref[...], preferred_element_type=jnp.float32)
    z = jnp.dot(a, z.astype(a.dtype), preferred_element_type=jnp.float32)
    z = z + b3_ref[...]                  # stays f32 -> -1e30 mask is safe
    col = jax.lax.broadcasted_iota(jnp.int32, z.shape, 1)
    z = jnp.where(col < num_classes, z, -1e30)
    m = jnp.max(z, axis=1, keepdims=True)
    s = z - m
    lse = jnp.log(jnp.sum(jnp.exp(s), axis=1, keepdims=True))
    o_ref[...] = (s - lse).astype(o_ref.dtype)


def _gcn_fused(a_p, x_p, params_p, num_classes, vmem_limit):
    np_ = a_p.shape[0]
    cp = params_p[2][0].shape[1]

    arrays = [a_p, x_p]
    in_specs = [pl.BlockSpec(a_p.shape, lambda i: (0, 0)),
                pl.BlockSpec(x_p.shape, lambda i: (0, 0))]
    for (w, b) in params_p:
        arrays += [w, b]
        in_specs += [pl.BlockSpec(w.shape, lambda i: (0, 0)),
                     pl.BlockSpec(b.shape, lambda i: (0, 0))]

    flops = 0
    prev = x_p.shape[1]
    for (w, _) in params_p:
        fout = w.shape[1]
        flops += 2 * np_ * prev * fout + 2 * np_ * np_ * fout
        prev = fout
    bytes_accessed = (a_p.size * 2 + x_p.size * 2 + np_ * cp * 4
                      + sum(w.size * 2 + b.size * 4 for (w, b) in params_p))

    kernel = functools.partial(_gcn_fused_kernel, num_classes=num_classes)
    return pl.pallas_call(
        kernel,
        out_shape=jax.ShapeDtypeStruct((np_, cp), jnp.float32),
        grid_spec=pltpu.PrefetchScalarGridSpec(
            num_scalar_prefetch=0,
            grid=(1,),
            in_specs=in_specs,
            out_specs=pl.BlockSpec((np_, cp), lambda i: (0, 0))),
        compiler_params=pltpu.CompilerParams(
            dimension_semantics=("arbitrary",),
            vmem_limit_bytes=vmem_limit),
        cost_estimate=pl.CostEstimate(flops=int(flops),
                                      transcendentals=int(np_ * cp),
                                      bytes_accessed=int(bytes_accessed)),
    )(*arrays)


# ---------------------------------------------------------------------------
# Tiled path (large graphs): layer-1 XW kernel + tiled A_hat @ XW kernel that
# also emits the NEXT layer's X@W in its finalize step.
# ---------------------------------------------------------------------------
def _xw_kernel(x_ref, w_ref, o_ref):
    o_ref[...] = jnp.dot(x_ref[...], w_ref[...],
                         preferred_element_type=jnp.float32).astype(o_ref.dtype)


def _xw(x_p, w_p, tm, vmem_limit):
    np_, fin = x_p.shape
    fout = w_p.shape[1]
    return pl.pallas_call(
        _xw_kernel,
        out_shape=jax.ShapeDtypeStruct((np_, fout), jnp.bfloat16),
        grid_spec=pltpu.PrefetchScalarGridSpec(
            num_scalar_prefetch=0,
            grid=(np_ // tm,),
            in_specs=[pl.BlockSpec((tm, fin), lambda i: (i, 0)),
                      pl.BlockSpec((fin, fout), lambda i: (0, 0))],
            out_specs=pl.BlockSpec((tm, fout), lambda i: (i, 0))),
        compiler_params=pltpu.CompilerParams(
            dimension_semantics=("parallel",),
            vmem_limit_bytes=vmem_limit),
        cost_estimate=pl.CostEstimate(
            flops=int(2 * np_ * fin * fout),
            transcendentals=0,
            bytes_accessed=int(x_p.size * 2 + w_p.size * 2 + np_ * fout * 2)),
    )(x_p, w_p)


def _agg_kernel(*refs, tk, xw_resident, apply_relu, apply_log_softmax,
                num_valid, fuse_next_w):
    if fuse_next_w:
        a_ref, xw_ref, b_ref, wn_ref, o_ref, acc_ref = refs
    else:
        a_ref, xw_ref, b_ref, o_ref, acc_ref = refs
    k = pl.program_id(1)

    @pl.when(k == 0)
    def _():
        acc_ref[...] = jnp.zeros_like(acc_ref)

    if xw_resident:
        # XW lives fully in VMEM (one HBM fetch for the whole grid); slice the
        # reduction chunk for this step out of VMEM.  k*tk is a multiple of 128.
        off = pl.multiple_of(k * tk, 128)
        xw_tile = xw_ref[pl.ds(off, tk), :]
    else:
        xw_tile = xw_ref[...]
    acc_ref[...] += jnp.dot(a_ref[...], xw_tile,
                            preferred_element_type=jnp.float32)

    # Bias / activation / next-layer X@W only in the finalize step — the inner
    # reduction loop stays pure MXU + DMA.
    @pl.when(k == pl.num_programs(1) - 1)
    def _():
        out = acc_ref[...] + b_ref[...]
        if apply_relu:
            out = jnp.maximum(out, 0.0)
        if apply_log_softmax:
            col = jax.lax.broadcasted_iota(jnp.int32, out.shape, 1)
            out = jnp.where(col < num_valid, out, -1e30)
            m = jnp.max(out, axis=1, keepdims=True)
            s = out - m
            lse = jnp.log(jnp.sum(jnp.exp(s), axis=1, keepdims=True))
            out = s - lse
        if fuse_next_w:
            # Emit the next layer's X@W directly (W_next resident in VMEM):
            # saves an HBM round-trip of the activations and a launch.
            out = jnp.dot(out.astype(wn_ref.dtype), wn_ref[...],
                          preferred_element_type=jnp.float32)
        o_ref[...] = out.astype(o_ref.dtype)


def _aggregate(a_p, xw_p, b_p, *, tm, tk, out_dtype, vmem_limit,
               apply_relu=False, apply_log_softmax=False, num_valid=0,
               next_w=None):
    np_ = a_p.shape[0]
    c = xw_p.shape[1]
    fuse_next_w = next_w is not None
    c_out = next_w.shape[1] if fuse_next_w else c
    n_row, n_k = np_ // tm, np_ // tk

    # Keep XW fully VMEM-resident (single HBM fetch) whenever it fits the
    # budget with headroom for the A tiles / accumulator / output buffers.
    xw_bytes = int(xw_p.size) * jnp.dtype(xw_p.dtype).itemsize
    xw_resident = 2 * xw_bytes <= vmem_limit // 3

    arrays = [a_p, xw_p, b_p]
    in_specs = [
        pl.BlockSpec((tm, tk), lambda i, k: (i, k)),            # A_hat tile
        (pl.BlockSpec((np_, c), lambda i, k: (0, 0)) if xw_resident
         else pl.BlockSpec((tk, c), lambda i, k: (k, 0))),      # XW
        pl.BlockSpec((1, c), lambda i, k: (0, 0)),              # bias
    ]
    if fuse_next_w:
        arrays.append(next_w)
        in_specs.append(pl.BlockSpec(next_w.shape, lambda i, k: (0, 0)))

    kernel = functools.partial(
        _agg_kernel, tk=tk, xw_resident=xw_resident, apply_relu=apply_relu,
        apply_log_softmax=apply_log_softmax, num_valid=num_valid,
        fuse_next_w=fuse_next_w)

    flops = 2 * np_ * np_ * c + (2 * np_ * c * c_out if fuse_next_w else 0)
    xw_stream = xw_bytes if xw_resident else xw_bytes * n_row
    out_bytes = np_ * c_out * jnp.dtype(out_dtype).itemsize
    bytes_accessed = int(a_p.size) * 2 + xw_stream + out_bytes

    return pl.pallas_call(
        kernel,
        out_shape=jax.ShapeDtypeStruct((np_, c_out), out_dtype),
        grid_spec=pltpu.PrefetchScalarGridSpec(
            num_scalar_prefetch=0,
            grid=(n_row, n_k),
            in_specs=in_specs,
            out_specs=pl.BlockSpec((tm, c_out), lambda i, k: (i, 0)),
            scratch_shapes=[pltpu.VMEM((tm, c), jnp.float32)]),
        compiler_params=pltpu.CompilerParams(
            dimension_semantics=("parallel", "arbitrary"),
            vmem_limit_bytes=vmem_limit),
        cost_estimate=pl.CostEstimate(
            flops=int(flops),
            transcendentals=int(np_ * c_out if apply_log_softmax else 0),
            bytes_accessed=int(bytes_accessed)),
    )(*arrays)


# ---------------------------------------------------------------------------
# Forward pass
# ---------------------------------------------------------------------------
def normalized_adjacency_padded(edge_index, num_nodes, padded_nodes,
                                dtype=jnp.bfloat16):
    """PyG GCNConv norm: self loops, deg over targets, D^-1/2 (A+I) D^-1/2.

    Built directly at the padded size in the MXU dtype so no transient f32
    NxN copy is ever materialized; padded rows/cols stay zero.
    """
    src, dst = edge_index[0], edge_index[1]
    loop = jnp.arange(num_nodes, dtype=edge_index.dtype)
    src = jnp.concatenate([src, loop])
    dst = jnp.concatenate([dst, loop])
    deg = jnp.zeros((num_nodes,), jnp.float32).at[dst].add(1.0)
    dinv = jnp.where(deg > 0, jax.lax.rsqrt(deg), 0.0)
    norm = (dinv[src] * dinv[dst]).astype(dtype)
    # A_hat[i, j] = norm for edge j -> i (aggregate sources into targets).
    return (jnp.zeros((padded_nodes, padded_nodes), dtype)
            .at[dst, src].add(norm))


def _choose_tiles(n):
    """(padded N, row tile tm, reduction tile tk) for the tiled path."""
    np128 = _round_up(n, _LANE)
    if np128 <= 2048:
        tk = np128
    else:
        tk = _LANE
        for t in (2048, 1024, 512, 256):
            if _round_up(np128, t) - np128 <= np128 // 16:   # <= ~6% padding
                tk = t
                break
    np_ = _round_up(np128, tk)
    # Row tile: as big as the reduction tile, but keep >= 2 row tiles when the
    # graph allows it so the "parallel" axis can feed both v7x TensorCores.
    tm = tk
    while tm >= 512 and np_ // tm < 2:
        tm //= 2
    return np_, tm, tk


def gcn_forward(x, edge_index, params, *, force_tiled=False):
    (w1, b1), (w2, b2), (w3, b3) = params
    n, f_in = x.shape
    h1, h2, num_classes = w1.shape[1], w2.shape[1], w3.shape[1]
    vmem_limit, fuse_max = _tpu_config()

    f0p = _round_up(f_in, _LANE)
    h1p = _round_up(h1, _LANE)
    h2p = _round_up(h2, _LANE)
    cp = _round_up(num_classes, _LANE)

    use_fused = (_round_up(n, _LANE) <= fuse_max) and not force_tiled
    if use_fused:
        np_ = _round_up(n, _LANE)
        tm = tk = np_
    else:
        np_, tm, tk = _choose_tiles(n)

    # Padded bf16 adjacency / features (padded rows & columns are zero so they
    # never contaminate valid outputs).
    a_p = normalized_adjacency_padded(edge_index, n, np_)
    x_p = _pad2d(x, np_, f0p, jnp.bfloat16)

    params_p = [
        (_pad2d(w1, f0p, h1p, jnp.bfloat16),
         _pad2d(b1.reshape(1, -1), 1, h1p, jnp.float32)),
        (_pad2d(w2, h1p, h2p, jnp.bfloat16),
         _pad2d(b2.reshape(1, -1), 1, h2p, jnp.float32)),
        (_pad2d(w3, h2p, cp, jnp.bfloat16),
         _pad2d(b3.reshape(1, -1), 1, cp, jnp.float32)),
    ]

    if use_fused:
        out_p = _gcn_fused(a_p, x_p, params_p, num_classes, vmem_limit)
    else:
        (w1p, b1p), (w2p, b2p), (w3p, b3p) = params_p
        # Layer 1's X@W1 is the only standalone projection; layers 2/3 get
        # their X@W emitted by the previous aggregation's finalize step.
        tm_xw = tm
        while tm_xw > 512 and tm_xw % 2 == 0 and np_ % (tm_xw // 2) == 0:
            tm_xw //= 2
        xw1 = _xw(x_p, w1p, tm_xw, vmem_limit)
        h2_xw = _aggregate(a_p, xw1, b1p, tm=tm, tk=tk,
                           out_dtype=jnp.bfloat16, vmem_limit=vmem_limit,
                           apply_relu=True, next_w=w2p)
        # TODO(synk): F.dropout(training=self.training) applied as identity (eval).
        h3_xw = _aggregate(a_p, h2_xw, b2p, tm=tm, tk=tk,
                           out_dtype=jnp.bfloat16, vmem_limit=vmem_limit,
                           apply_relu=True, next_w=w3p)
        out_p = _aggregate(a_p, h3_xw, b3p, tm=tm, tk=tk,
                           out_dtype=jnp.float32, vmem_limit=vmem_limit,
                           apply_log_softmax=True, num_valid=num_classes)
        # TODO(synk): block-sparse A_hat via scalar-prefetched block indices
        # (and fp8/int8 A on v7x/v5e) would cut the dominant HBM stream further.
    return out_p[:n, :num_classes]


def glorot(key, shape):
    lim = (6.0 / (shape[0] + shape[1])) ** 0.5
    return jax.random.uniform(key, shape, jnp.float32, -lim, lim)


if __name__ == "__main__":
    num_nodes = 16
    num_features = 8
    num_classes = 4
    num_edges = 40

    key = jax.random.PRNGKey(0)
    kx, ke_src, ke_dst, kw1, kw2, kw3 = jax.random.split(key, 6)

    x = jax.random.normal(kx, (num_nodes, num_features), jnp.float32)
    src = jax.random.randint(ke_src, (num_edges,), 0, num_nodes)
    dst = jax.random.randint(ke_dst, (num_edges,), 0, num_nodes)
    edge_index = jnp.stack([src, dst]).astype(jnp.int32)

    # GCNConv(num_features, 128), GCNConv(128, 16), GCNConv(16, num_classes)
    params = [
        (glorot(kw1, (num_features, 128)), jnp.zeros((128,), jnp.float32)),
        (glorot(kw2, (128, 16)), jnp.zeros((16,), jnp.float32)),
        (glorot(kw3, (16, num_classes)), jnp.zeros((num_classes,), jnp.float32)),
    ]

    # Small-graph fused path (used for this demo size) ...
    out_fused = gcn_forward(x, edge_index, params)
    # ... and the tiled/pipelined path, exercised explicitly for coverage.
    out_tiled = gcn_forward(x, edge_index, params, force_tiled=True)
    jax.block_until_ready((out_fused, out_tiled))

    assert out_fused.shape == (num_nodes, num_classes)
    assert out_tiled.shape == (num_nodes, num_classes)
    assert bool(jnp.all(jnp.isfinite(out_fused)))
    assert float(jnp.max(jnp.abs(out_fused - out_tiled))) < 1e-1
    print("KERNEL_OK")
</pallas_src>

<mosaic_0001>
module attributes {stable_mosaic.version = 11 : i64} {
  func.func @_gcn_fused_kernel(%arg0: i32, %arg1: memref<128x128xbf16, #tpu.memory_space<vmem>>, %arg2: memref<128x128xbf16, #tpu.memory_space<vmem>>, %arg3: memref<128x128xbf16, #tpu.memory_space<vmem>>, %arg4: memref<1x128xf32, #tpu.memory_space<vmem>>, %arg5: memref<128x128xbf16, #tpu.memory_space<vmem>>, %arg6: memref<1x128xf32, #tpu.memory_space<vmem>>, %arg7: memref<128x128xbf16, #tpu.memory_space<vmem>>, %arg8: memref<1x128xf32, #tpu.memory_space<vmem>>, %arg9: memref<128x128xf32, #tpu.memory_space<vmem>>) attributes {dimension_semantics = [#tpu.dimension_semantics<arbitrary>], iteration_bounds = array<i64: 1>, scalar_prefetch = 0 : i64, scratch_operands = 0 : i64, tpu.core_type = #tpu.core_type<tc>, window_params = [{pipeline_mode = #tpu.pipeline_mode<synchronous>, transform_indices = @transform_0, window_bounds = array<i64: 128, 128>}, {pipeline_mode = #tpu.pipeline_mode<synchronous>, transform_indices = @transform_1, window_bounds = array<i64: 128, 128>}, {pipeline_mode = #tpu.pipeline_mode<synchronous>, transform_indices = @transform_2, window_bounds = array<i64: 128, 128>}, {pipeline_mode = #tpu.pipeline_mode<synchronous>, transform_indices = @transform_3, window_bounds = array<i64: 1, 128>}, {pipeline_mode = #tpu.pipeline_mode<synchronous>, transform_indices = @transform_4, window_bounds = array<i64: 128, 128>}, {pipeline_mode = #tpu.pipeline_mode<synchronous>, transform_indices = @transform_5, window_bounds = array<i64: 1, 128>}, {pipeline_mode = #tpu.pipeline_mode<synchronous>, transform_indices = @transform_6, window_bounds = array<i64: 128, 128>}, {pipeline_mode = #tpu.pipeline_mode<synchronous>, transform_indices = @transform_7, window_bounds = array<i64: 1, 128>}, {pipeline_mode = #tpu.pipeline_mode<synchronous>, transform_indices = @transform_8, window_bounds = array<i64: 128, 128>}]} {
    %c0 = arith.constant 0 : index
    %c0_0 = arith.constant 0 : index
    %0 = vector.load %arg1[%c0, %c0_0] : memref<128x128xbf16, #tpu.memory_space<vmem>>, vector<128x128xbf16>
    %c0_1 = arith.constant 0 : index
    %c0_2 = arith.constant 0 : index
    %1 = vector.load %arg2[%c0_1, %c0_2] : memref<128x128xbf16, #tpu.memory_space<vmem>>, vector<128x128xbf16>
    %c0_3 = arith.constant 0 : index
    %c0_4 = arith.constant 0 : index
    %2 = vector.load %arg3[%c0_3, %c0_4] : memref<128x128xbf16, #tpu.memory_space<vmem>>, vector<128x128xbf16>
    %cst = arith.constant dense<0.000000e+00> : vector<128x128xf32>
    %3 = tpu.matmul %1, %2, %cst {dimension_numbers = #tpu.dot_dimension_numbers<[1], [0], [0], [1], [0, 0, 1, 1], [], []>} : vector<128x128xbf16>, vector<128x128xbf16>, vector<128x128xf32> -> vector<128x128xf32>
    %4 = arith.truncf %3 : vector<128x128xf32> to vector<128x128xbf16>
    %cst_5 = arith.constant dense<0.000000e+00> : vector<128x128xf32>
    %5 = tpu.matmul %0, %4, %cst_5 {dimension_numbers = #tpu.dot_dimension_numbers<[1], [0], [0], [1], [0, 0, 1, 1], [], []>} : vector<128x128xbf16>, vector<128x128xbf16>, vector<128x128xf32> -> vector<128x128xf32>
    %c0_6 = arith.constant 0 : index
    %c0_7 = arith.constant 0 : index
    %6 = vector.load %arg4[%c0_6, %c0_7] : memref<1x128xf32, #tpu.memory_space<vmem>>, vector<1x128xf32>
    %7 = vector.broadcast %6 : vector<1x128xf32> to vector<128x128xf32>
    %8 = arith.addf %5, %7 : vector<128x128xf32>
    %cst_8 = arith.constant 0.000000e+00 : f32
    %9 = vector.broadcast %cst_8 : f32 to vector<128x128xf32>
    %10 = arith.maximumf %8, %9 : vector<128x128xf32>
    %11 = arith.truncf %10 : vector<128x128xf32> to vector<128x128xbf16>
    %c0_9 = arith.constant 0 : index
    %c0_10 = arith.constant 0 : index
    %12 = vector.load %arg5[%c0_9, %c0_10] : memref<128x128xbf16, #tpu.memory_space<vmem>>, vector<128x128xbf16>
    %cst_11 = arith.constant dense<0.000000e+00> : vector<128x128xf32>
    %13 = tpu.matmul %11, %12, %cst_11 {dimension_numbers = #tpu.dot_dimension_numbers<[1], [0], [0], [1], [0, 0, 1, 1], [], []>} : vector<128x128xbf16>, vector<128x128xbf16>, vector<128x128xf32> -> vector<128x128xf32>
    %14 = arith.truncf %13 : vector<128x128xf32> to vector<128x128xbf16>
    %cst_12 = arith.constant dense<0.000000e+00> : vector<128x128xf32>
    %15 = tpu.matmul %0, %14, %cst_12 {dimension_numbers = #tpu.dot_dimension_numbers<[1], [0], [0], [1], [0, 0, 1, 1], [], []>} : vector<128x128xbf16>, vector<128x128xbf16>, vector<128x128xf32> -> vector<128x128xf32>
    %c0_13 = arith.constant 0 : index
    %c0_14 = arith.constant 0 : index
    %16 = vector.load %arg6[%c0_13, %c0_14] : memref<1x128xf32, #tpu.memory_space<vmem>>, vector<1x128xf32>
    %17 = vector.broadcast %16 : vector<1x128xf32> to vector<128x128xf32>
    %18 = arith.addf %15, %17 : vector<128x128xf32>
    %cst_15 = arith.constant 0.000000e+00 : f32
    %19 = vector.broadcast %cst_15 : f32 to vector<128x128xf32>
    %20 = arith.maximumf %18, %19 : vector<128x128xf32>
    %21 = arith.truncf %20 : vector<128x128xf32> to vector<128x128xbf16>
    %c0_16 = arith.constant 0 : index
    %c0_17 = arith.constant 0 : index
    %22 = vector.load %arg7[%c0_16, %c0_17] : memref<128x128xbf16, #tpu.memory_space<vmem>>, vector<128x128xbf16>
    %cst_18 = arith.constant dense<0.000000e+00> : vector<128x128xf32>
    %23 = tpu.matmul %21, %22, %cst_18 {dimension_numbers = #tpu.dot_dimension_numbers<[1], [0], [0], [1], [0, 0, 1, 1], [], []>} : vector<128x128xbf16>, vector<128x128xbf16>, vector<128x128xf32> -> vector<128x128xf32>
    %24 = arith.truncf %23 : vector<128x128xf32> to vector<128x128xbf16>
    %cst_19 = arith.constant dense<0.000000e+00> : vector<128x128xf32>
    %25 = tpu.matmul %0, %24, %cst_19 {dimension_numbers = #tpu.dot_dimension_numbers<[1], [0], [0], [1], [0, 0, 1, 1], [], []>} : vector<128x128xbf16>, vector<128x128xbf16>, vector<128x128xf32> -> vector<128x128xf32>
    %c0_20 = arith.constant 0 : index
    %c0_21 = arith.constant 0 : index
    %26 = vector.load %arg8[%c0_20, %c0_21] : memref<1x128xf32, #tpu.memory_space<vmem>>, vector<1x128xf32>
    %27 = vector.broadcast %26 : vector<1x128xf32> to vector<128x128xf32>
    %28 = arith.addf %25, %27 : vector<128x128xf32>
    %29 = tpu.iota {dimensions = array<i32: 1>} : vector<128x128xi32>
    %c4_i32 = arith.constant 4 : i32
    %30 = vector.broadcast %c4_i32 : i32 to vector<128x128xi32>
    %31 = arith.cmpi slt, %29, %30 : vector<128x128xi32>
    %cst_22 = arith.constant -1.000000e+30 : f32
    %32 = vector.broadcast %cst_22 : f32 to vector<128x128xf32>
    %33 = arith.select %31, %28, %32 : vector<128x128xi1>, vector<128x128xf32>
    %cst_23 = arith.constant dense<0xFF800000> : vector<128xf32>
    %34 = vector.multi_reduction <maximumf>, %33, %cst_23 [1] : vector<128x128xf32> to vector<128xf32>
    %35 = vector.shape_cast %34 : vector<128xf32> to vector<128x1xf32>
    %36 = vector.broadcast %35 : vector<128x1xf32> to vector<128x128xf32>
    %37 = arith.subf %33, %36 : vector<128x128xf32>
    %38 = math.exp %37 : vector<128x128xf32>
    %cst_24 = arith.constant dense<0.000000e+00> : vector<128xf32>
    %39 = vector.multi_reduction <add>, %38, %cst_24 [1] : vector<128x128xf32> to vector<128xf32>
    %40 = vector.shape_cast %39 : vector<128xf32> to vector<128x1xf32>
    %41 = math.log %40 : vector<128x1xf32>
    %42 = vector.broadcast %41 : vector<128x1xf32> to vector<128x128xf32>
    %43 = arith.subf %37, %42 : vector<128x128xf32>
    %c0_25 = arith.constant 0 : index
    %c0_26 = arith.constant 0 : index
    %44 = vector.load %arg9[%c0_25, %c0_26] : memref<128x128xf32, #tpu.memory_space<vmem>>, vector<128x128xf32>
    tpu.vector_store %arg9[%c0_25, %c0_26], %43 {strides = array<i32>} : memref<128x128xf32, #tpu.memory_space<vmem>>, vector<128x128xf32>,
    return
  }
  func.func @transform_0(%arg0: i32) -> (i32, i32) {
    %c0_i32 = arith.constant 0 : i32
    %c0_i32_0 = arith.constant 0 : i32
    %c0_i32_1 = arith.constant 0 : i32
    return %c0_i32, %c0_i32_0 : i32, i32
  }
  func.func @transform_1(%arg0: i32) -> (i32, i32) {
    %c0_i32 = arith.constant 0 : i32
    %c0_i32_0 = arith.constant 0 : i32
    %c0_i32_1 = arith.constant 0 : i32
    return %c0_i32, %c0_i32_0 : i32, i32
  }
  func.func @transform_2(%arg0: i32) -> (i32, i32) {
    %c0_i32 = arith.constant 0 : i32
    %c0_i32_0 = arith.constant 0 : i32
    %c0_i32_1 = arith.constant 0 : i32
    return %c0_i32, %c0_i32_0 : i32, i32
  }
  func.func @transform_3(%arg0: i32) -> (i32, i32) {
    %c0_i32 = arith.constant 0 : i32
    %c0_i32_0 = arith.constant 0 : i32
    %c0_i32_1 = arith.constant 0 : i32
    return %c0_i32, %c0_i32_0 : i32, i32
  }
  func.func @transform_4(%arg0: i32) -> (i32, i32) {
    %c0_i32 = arith.constant 0 : i32
    %c0_i32_0 = arith.constant 0 : i32
    %c0_i32_1 = arith.constant 0 : i32
    return %c0_i32, %c0_i32_0 : i32, i32
  }
  func.func @transform_5(%arg0: i32) -> (i32, i32) {
    %c0_i32 = arith.constant 0 : i32
    %c0_i32_0 = arith.constant 0 : i32
    %c0_i32_1 = arith.constant 0 : i32
    return %c0_i32, %c0_i32_0 : i32, i32
  }
  func.func @transform_6(%arg0: i32) -> (i32, i32) {
    %c0_i32 = arith.constant 0 : i32
    %c0_i32_0 = arith.constant 0 : i32
    %c0_i32_1 = arith.constant 0 : i32
    return %c0_i32, %c0_i32_0 : i32, i32
  }
  func.func @transform_7(%arg0: i32) -> (i32, i32) {
    %c0_i32 = arith.constant 0 : i32
    %c0_i32_0 = arith.constant 0 : i32
    %c0_i32_1 = arith.constant 0 : i32
    return %c0_i32, %c0_i32_0 : i32, i32
  }
  func.func @transform_8(%arg0: i32) -> (i32, i32) {
    %c0_i32 = arith.constant 0 : i32
    %c0_i32_0 = arith.constant 0 : i32
    %c0_i32_1 = arith.constant 0 : i32
    return %c0_i32, %c0_i32_0 : i32, i32
  }
}

</mosaic_0001>

<bundles_post_ra>
// kernel: tpu_custom_call.1
= control target key start
LH: loop header
LB: loop body
LE: loop exit
PB: predicated region body
PF: predicated region fallthrough
CT: control target
= control target key end

     0   :  { %13 = vsyncpa [#allocation3], 0  ;;  %s2141_s0 = inlined_call_operand.hbm [shape: bf16[128,128], index: 0, kind: input, shape index: {}]   ;;  %s2142_s1 = inlined_call_operand.hbm [shape: bf16[128,128], index: 1, kind: input, shape index: {}]   ;;  %s2143_s2 = inlined_call_operand.hbm [shape: bf16[128,128], index: 2, kind: input, shape index: {}]   ;;  %s2144_s3 = inlined_call_operand.vmem [shape: f32[1,128], index: 3, kind: input, shape index: {}]   ;;  %s2145_s4 = inlined_call_operand.hbm [shape: bf16[128,128], index: 4, kind: input, shape index: {}]   ;;  %s2146_s5 = inlined_call_operand.vmem [shape: f32[1,128], index: 5, kind: input, shape index: {}]   ;;  %s2147_s6 = inlined_call_operand.hbm [shape: bf16[128,128], index: 6, kind: input, shape index: {}]   ;;  %s2148_s7 = inlined_call_operand.vmem [shape: f32[1,128], index: 7, kind: input, shape index: {}]   ;;  %s2149_s8 = inlined_call_operand.hbm [shape: f32[128,128], index: 8, kind: output, shape index: {}]  }
   0x1   :  { %14 = vsyncpa [#allocation6], 0 }
   0x2   :  { %15 = vsyncpa [#allocation9], 0 }
   0x3   :  { %16 = vsyncpa [#allocation4], 0  ;;  %s1881_s27 = smov [#allocation5]   ;;  %s1882_s29 = smov [#allocation8]  }
   0x4   :  { %s34_s28 = sshll.u32 %s1881_s27, 4  ;;  %s60_s30 = sshll.u32 %s1882_s29, 4  ;;  %s35_s28 = int_to_ptr.vmem [resolvable:$true] %s34_s28  ;;  %s61_s30 = int_to_ptr.vmem [resolvable:$true] %s60_s30 }
   0x5   :  { %s1761_s9 = scalar_lea.vmem %s35_s28, 1024  ;;  %p1766_p1 = scmp.lt.s32.totalorder %s35_s28, %s35_s28 }
   0x6   :  { %p1762_p0 = scmp.ne.s32.totalorder %s35_s28, %s1761_s9  ;;  %p1767_p2 = scmp.lt.s32.totalorder %s1761_s9, %s1761_s9 }
   0x8   :  { %p1768_p3 = por %p1767_p2, %p1766_p1 }
   0xa   :  { %p1769_p4 = pnand %p1768_p3, %p1762_p0 }
   0xc   :  { %1772 = shalt.err (!%p1769_p4)
}
   0xd   :  { %s1883_s10 = smov 64   ;;  %s1884_s11 = smov 4  }
   0xe   :  { %40 = dma.hbm_to_vmem [thread:$0]  %s2142_s1, 1024, %s35_s28, [#allocation6], %s1883_s10, %s1883_s10, %s1884_s11  }
   0xf   :  { %s1781_s14 = scalar_lea.vmem %s61_s30, 1024  ;;  %p1786_p6 = scmp.lt.s32.totalorder %s61_s30, %s61_s30 }
  0x10   :  { %p1782_p5 = scmp.ne.s32.totalorder %s61_s30, %s1781_s14  ;;  %p1787_p7 = scmp.lt.s32.totalorder %s1781_s14, %s1781_s14 }
  0x12   :  { %p1788_p8 = por %p1787_p7, %p1786_p6 }
  0x14   :  { %p1789_p9 = pnand %p1788_p8, %p1782_p5 }
  0x16   :  { %1792 = shalt.err (!%p1789_p9)
}
  0x17   :  { %66 = dma.hbm_to_vmem [thread:$0]  %s2145_s4, 1024, %s61_s30, [#allocation9], %s1883_s10, %s1883_s10, %s1884_s11  }
  0x18   :  { %s1885_s17 = smov [#allocation2]   ;;  %s1886_s19 = smov [#allocation7]  }
  0x19   :  { %s22_s18 = sshll.u32 %s1885_s17, 4  ;;  %s46_s20 = sshll.u32 %s1886_s19, 4  ;;  %s23_s18 = int_to_ptr.vmem [resolvable:$true] %s22_s18  ;;  %s47_s20 = int_to_ptr.vmem [resolvable:$true] %s46_s20 }
  0x1a   :  { %s1801_s1 = scalar_lea.vmem %s23_s18, 1024  ;;  %p1806_p11 = scmp.lt.s32.totalorder %s23_s18, %s23_s18 }
  0x1b   :  { %p1802_p10 = scmp.ne.s32.totalorder %s23_s18, %s1801_s1  ;;  %p1807_p12 = scmp.lt.s32.totalorder %s1801_s1, %s1801_s1 }
  0x1d   :  { %p1808_p13 = por %p1807_p12, %p1806_p11 }
  0x1f   :  { %p1809_p0 = pnand %p1808_p13, %p1802_p10 }
  0x21   :  { %1812 = shalt.err (!%p1809_p0)
}
  0x22   :  { %28 = dma.hbm_to_vmem [thread:$0]  %s2141_s0, 1024, %s23_s18, [#allocation3], %s1883_s10, %s1883_s10, %s1884_s11  }
  0x23   :  { %s1821_s4 = scalar_lea.vmem %s47_s20, 1024  ;;  %p1826_p2 = scmp.lt.s32.totalorder %s47_s20, %s47_s20 }
  0x24   :  { %p1822_p1 = scmp.ne.s32.totalorder %s47_s20, %s1821_s4  ;;  %p1827_p3 = scmp.lt.s32.totalorder %s1821_s4, %s1821_s4 }
  0x26   :  { %p1828_p4 = por %p1827_p3, %p1826_p2 }
  0x28   :  { %p1829_p5 = pnand %p1828_p4, %p1822_p1 }
  0x2a   :  { %1832 = shalt.err (!%p1829_p5)
}
  0x2b   :  { %52 = dma.hbm_to_vmem [thread:$0]  %s2143_s2, 1024, %s47_s20, [#allocation6], %s1883_s10, %s1883_s10, %s1884_s11  }
  0x2c   :  { %s1887_s25 = smov [#allocation10]  }
  0x2d   :  { %s74_s26 = sshll.u32 %s1887_s25, 4  ;;  %s75_s26 = int_to_ptr.vmem [resolvable:$true] %s74_s26 }
  0x2e   :  { %s1841_s27 = scalar_lea.vmem %s75_s26, 1024  ;;  %p1846_p7 = scmp.lt.s32.totalorder %s75_s26, %s75_s26 }
  0x2f   :  { %p1842_p6 = scmp.ne.s32.totalorder %s75_s26, %s1841_s27  ;;  %p1847_p8 = scmp.lt.s32.totalorder %s1841_s27, %s1841_s27 }
  0x31   :  { %p1848_p9 = por %p1847_p8, %p1846_p7 }
  0x33   :  { %p1849_p10 = pnand %p1848_p9, %p1842_p6 }
  0x35   :  { %1852 = shalt.err (!%p1849_p10)
}
  0x36   :  { %80 = dma.hbm_to_vmem [thread:$0]  %s2147_s6, 1024, %s75_s26, [#allocation9], %s1883_s10, %s1883_s10, %s1884_s11  }
  0x37   :  { %1873 = dma.done.wait [#allocation3], 1024  }
  0x38   :  { %1874 = vsyncadd [#allocation3], 4294966272 }
  0x39   :  { %1875 = dma.done.wait [#allocation6], 2048  }
  0x3a   :  { %1876 = vsyncadd [#allocation6], 4294965248 }
  0x3b   :  { %1877 = dma.done.wait [#allocation9], 2048  }
  0x3c   :  { %1878 = vsyncadd [#allocation9], 4294965248  ;;  %v1649_v0 = vld [vmem:[#allocation7 + $0x38] sm:$0xff]   ;;  %v1650_v1 = vld [vmem:[#allocation7 + $0x30] sm:$0xff]  }
  0x3d   :  { %1447 = vmatprep.subr.bf16.mxu0 %v1649_v0  ;;  %v1651_v2 = vld [vmem:[#allocation7 + $0x28] sm:$0xff]   ;;  %v1652_v3 = vld [vmem:[#allocation7 + $0x20] sm:$0xff]   ;;  %v1653_v5 = vld [vmem:[#allocation7 + $0x18] sm:$0xff]  }
  0x3e   :  { %1448 = vmatpush3.bf16.msra.mxu0 %v1649_v0  ;;  %v1657_v4 = vld [vmem:[#allocation5] sm:$0xff]   ;;  %v1654_v6 = vld [vmem:[#allocation7 + $0x10] sm:$0xff]   ;;  %v1655_v7 = vld [vmem:[#allocation7 + $0x8] sm:$0xff]  }
  0x3f   :  { %1449 = vmatprep.subr.bf16.mxu0 %v1650_v1  ;;  %1463 = vmatprep.mubr.bf16.mxu0 %v1657_v4  ;;  %v1656_v8 = vld [vmem:[#allocation7] sm:$0xff]   ;;  %v1658_v9 = vld [vmem:[#allocation5 + $0x8] sm:$0xff]   ;;  %v1659_v10 = vld [vmem:[#allocation5 + $0x10] sm:$0xff]  }
  0x40   :  { %v1660_v11 = vld [vmem:[#allocation5 + $0x18] sm:$0xff]   ;;  %v1661_v12 = vld [vmem:[#allocation5 + $0x20] sm:$0xff]   ;;  %v1662_v13 = vld [vmem:[#allocation5 + $0x28] sm:$0xff]  }
  0x41   :  { %v1663_v14 = vld [vmem:[#allocation5 + $0x30] sm:$0xff]   ;;  %v1664_v15 = vld [vmem:[#allocation5 + $0x38] sm:$0xff]   ;;  %v1966_v16 = vld [vmem:[#allocation2] sm:$0xff]  }
  0x42   :  { %1450 = vmatpush3.bf16.msra.mxu0 %v1650_v1  ;;  %1495 = vmatprep.mubr.bf16.mxu1 %v1966_v16  ;;  %v1673_v17 = vld [vmem:[#allocation8 + $0x38] sm:$0xff]   ;;  %v1674_v18 = vld [vmem:[#allocation8 + $0x30] sm:$0xff]   ;;  %v1675_v19 = vld [vmem:[#allocation8 + $0x28] sm:$0xff]  }
  0x43   :  { %1451 = vmatprep.subr.bf16.mxu0 %v1651_v2  ;;  %v1676_v20 = vld [vmem:[#allocation8 + $0x20] sm:$0xff]   ;;  %v1677_v21 = vld [vmem:[#allocation8 + $0x18] sm:$0xff]   ;;  %v1969_v46 = vld [vmem:[#allocation2 + $0x8] sm:$0xff]  }
  0x44   :  { %v1971_v47 = vld [vmem:[#allocation2 + $0x10] sm:$0xff]   ;;  %v1975_v48 = vld [vmem:[#allocation2 + $0x18] sm:$0xff]   ;;  %v1977_v49 = vld [vmem:[#allocation2 + $0x20] sm:$0xff]  }
  0x45   :  { %v1981_v50 = vld [vmem:[#allocation2 + $0x28] sm:$0xff]   ;;  %v1983_v51 = vld [vmem:[#allocation2 + $0x30] sm:$0xff]   ;;  %v1987_v52 = vld [vmem:[#allocation2 + $0x38] sm:$0xff]  }
  0x46   :  { %1452 = vmatpush3.bf16.msra.mxu0 %v1651_v2  ;;  %v1678_v53 = vld [vmem:[#allocation8 + $0x10] sm:$0xff]   ;;  %v1679_v54 = vld [vmem:[#allocation8 + $0x8] sm:$0xff]   ;;  %v1680_v55 = vld [vmem:[#allocation8] sm:$0xff]  }
  0x47   :  { %1453 = vmatprep.subr.bf16.mxu0 %v1652_v3  ;;  %v1324_v58 = vld [vmem:[%s2144_s3] ss:$0 sm:$0xff] }
  0x4a   :  { %1454 = vmatpush3.bf16.msra.mxu0 %v1652_v3 }
  0x4b   :  { %1455 = vmatprep.subr.bf16.mxu0 %v1653_v5 }
  0x4e   :  { %1456 = vmatpush3.bf16.msra.mxu0 %v1653_v5 }
  0x4f   :  { %1457 = vmatprep.subr.bf16.mxu0 %v1654_v6 }
  0x52   :  { %1458 = vmatpush3.bf16.msra.mxu0 %v1654_v6 }
  0x53   :  { %1459 = vmatprep.subr.bf16.mxu0 %v1655_v7 }
  0x56   :  { %1460 = vmatpush3.bf16.msra.mxu0 %v1655_v7 }
  0x57   :  { %1461 = vmatprep.subr.bf16.mxu0 %v1656_v8 }
  0x5a   :  { %1462 = vmatpush3.bf16.msra.mxu0 %v1656_v8 }
  0x5b   :  { %1511 = vmatprep.subr.bf16.mxu0 %v1673_v17 }
  0x5d   :  { %1464 = vmatmul.mubr.bf16.vlgmr.msra.gmra.mxu0 %v1658_v9 }
  0x5e   :  { %1467 = vmatprep.mubr.bf16.mxu0 %v1659_v10  ;;  %1512 = vmatpush3.bf16.msra.mxu0 %v1673_v17 }
  0x5f   :  { %1513 = vmatprep.subr.bf16.mxu0 %v1674_v18 }
  0x62   :  { %1514 = vmatpush3.bf16.msra.mxu0 %v1674_v18 }
  0x63   :  { %1515 = vmatprep.subr.bf16.mxu0 %v1675_v19 }
  0x65   :  { %1468 = vmatmul.mubr.bf16.gmra.mxu0 %v1660_v11 }
  0x66   :  { %1471 = vmatprep.mubr.bf16.mxu0 %v1661_v12  ;;  %1516 = vmatpush3.bf16.msra.mxu0 %v1675_v19 }
  0x67   :  { %1517 = vmatprep.subr.bf16.mxu0 %v1676_v20 }
  0x6a   :  { %1518 = vmatpush3.bf16.msra.mxu0 %v1676_v20 }
  0x6b   :  { %1519 = vmatprep.subr.bf16.mxu0 %v1677_v21 }
  0x6d   :  { %1472 = vmatmul.mubr.bf16.gmra.mxu0 %v1662_v13 }
  0x6e   :  { %1475 = vmatprep.mubr.bf16.mxu0 %v1663_v14  ;;  %1520 = vmatpush3.bf16.msra.mxu0 %v1677_v21 }
  0x6f   :  { %1521 = vmatprep.subr.bf16.mxu0 %v1678_v53 }
  0x72   :  { %1522 = vmatpush3.bf16.msra.mxu0 %v1678_v53 }
  0x73   :  { %1523 = vmatprep.subr.bf16.mxu0 %v1679_v54 }
  0x75   :  { %1476 = vmatmul.mubr.bf16.gmra.mxu0 %v1664_v15 }
  0x76   :  { %1524 = vmatpush3.bf16.msra.mxu0 %v1679_v54 }
  0x77   :  { %1525 = vmatprep.subr.bf16.mxu0 %v1680_v55 }
  0x7a   :  { %1526 = vmatpush3.bf16.msra.mxu0 %v1680_v55 }
 0x11d   :  { %v1465_v22 = vpop.f32.mrf.mxu0 }
 0x11f   :  { %v277_v23 = vpop.f32.mrf.mxu0 }
 0x121   :  { %v1466_v24 = vpop.f32.mrf.mxu0 }
 0x122   :  { %v341_v44 = vpack.c.bf16 %v1466_v24, %v1465_v22 }
 0x123   :  { %v280_v25 = vpop.f32.mrf.mxu0 }
 0x124   :  { %v340_v45 = vpack.c.bf16 %v280_v25, %v277_v23 }
 0x125   :  { %v1469_v26 = vpop.f32.mrf.mxu0 }
 0x127   :  { %v293_v27 = vpop.f32.mrf.mxu0 }
 0x129   :  { %v1470_v28 = vpop.f32.mrf.mxu0 }
 0x12a   :  { %v343_v42 = vpack.c.bf16 %v1470_v28, %v1469_v26 }
 0x12b   :  { %v296_v29 = vpop.f32.mrf.mxu0 }
 0x12c   :  { %v342_v43 = vpack.c.bf16 %v296_v29, %v293_v27 }
 0x12d   :  { %v1473_v30 = vpop.f32.mrf.mxu0 }
 0x12f   :  { %v309_v31 = vpop.f32.mrf.mxu0 }
 0x131   :  { %v1474_v32 = vpop.f32.mrf.mxu0 }
 0x132   :  { %v345_v40 = vpack.c.bf16 %v1474_v32, %v1473_v30 }
 0x133   :  { %v312_v33 = vpop.f32.mrf.mxu0 }
 0x134   :  { %v344_v41 = vpack.c.bf16 %v312_v33, %v309_v31 }
 0x135   :  { %v1477_v34 = vpop.f32.mrf.mxu0 }
 0x137   :  { %v325_v35 = vpop.f32.mrf.mxu0 }
 0x139   :  { %v1478_v36 = vpop.f32.mrf.mxu0 }
 0x13a   :  { %v347_v37 = vpack.c.bf16 %v1478_v36, %v1477_v34 }
 0x13b   :  { %v328_v38 = vpop.f32.mrf.mxu0 }
 0x13c   :  { %v346_v39 = vpack.c.bf16 %v328_v38, %v325_v35  ;;  %1479 = vmatprep.subr.bf16.mxu1 %v347_v37 }
 0x13d   :  { %1480 = vmatpush3.bf16.msra.mxu1 %v347_v37 }
 0x13e   :  { %1481 = vmatprep.subr.bf16.mxu1 %v346_v39 }
 0x141   :  { %1482 = vmatpush3.bf16.msra.mxu1 %v346_v39 }
 0x142   :  { %1483 = vmatprep.subr.bf16.mxu1 %v345_v40 }
 0x145   :  { %1484 = vmatpush3.bf16.msra.mxu1 %v345_v40 }
 0x146   :  { %1485 = vmatprep.subr.bf16.mxu1 %v344_v41 }
 0x149   :  { %1486 = vmatpush3.bf16.msra.mxu1 %v344_v41 }
 0x14a   :  { %1487 = vmatprep.subr.bf16.mxu1 %v343_v42 }
 0x14d   :  { %1488 = vmatpush3.bf16.msra.mxu1 %v343_v42 }
 0x14e   :  { %1489 = vmatprep.subr.bf16.mxu1 %v342_v43 }
 0x151   :  { %1490 = vmatpush3.bf16.msra.mxu1 %v342_v43 }
 0x152   :  { %1491 = vmatprep.subr.bf16.mxu1 %v341_v44 }
 0x155   :  { %1492 = vmatpush3.bf16.msra.mxu1 %v341_v44 }
 0x156   :  { %1493 = vmatprep.subr.bf16.mxu1 %v340_v45 }
 0x159   :  { %1494 = vmatpush3.bf16.msra.mxu1 %v340_v45 }
 0x15c   :  { %1496 = vmatmul.mubr.bf16.vlgmr.msra.gmra.mxu1 %v1969_v46 }
 0x15d   :  { %1499 = vmatprep.mubr.bf16.mxu1 %v1971_v47 }
 0x164   :  { %1500 = vmatmul.mubr.bf16.gmra.mxu1 %v1975_v48 }
 0x165   :  { %1503 = vmatprep.mubr.bf16.mxu1 %v1977_v49 }
 0x16c   :  { %1504 = vmatmul.mubr.bf16.gmra.mxu1 %v1981_v50 }
 0x16d   :  { %1507 = vmatprep.mubr.bf16.mxu1 %v1983_v51 }
 0x174   :  { %1508 = vmatmul.mubr.bf16.gmra.mxu1 %v1987_v52 }
 0x175   :  { %1559 = vmatprep.mubr.bf16.mxu1 %v1966_v16 }
 0x21c   :  { %v1497_v56 = vpop.f32.mrf.mxu1 }
 0x21d   :  { %v446_v62 = vadd.f32 %v1497_v56, %v1324_v58 }
 0x21e   :  { %v437_v57 = vpop.f32.mrf.mxu1 }
 0x21f   :  { %v438_v60 = vadd.f32 %v1324_v58, %v437_v57  ;;  %v502_v5 = vmax.f32 %v446_v62, 0.0  ;;  %v1681_v57 = vld [vmem:[#allocation10 + $0x38] sm:$0xff]  }
 0x220   :  { %v1498_v59 = vpop.f32.mrf.mxu1  ;;  %1575 = vmatprep.subr.bf16.mxu0 %v1681_v57 }
 0x221   :  { %v449_v61 = vadd.f32 %v1498_v59, %v1324_v58  ;;  %v500_v3 = vmax.f32 %v438_v60, 0.0  ;;  %v1682_v59 = vld [vmem:[#allocation10 + $0x30] sm:$0xff]   ;;  %v1683_v60 = vld [vmem:[#allocation10 + $0x28] sm:$0xff]  }
 0x222   :  { %v440_v63 = vpop.f32.mrf.mxu1 }
 0x223   :  { %v441_v0 = vadd.f32 %v1324_v58, %v440_v63  ;;  %v503_v1 = vmax.f32 %v449_v61, 0.0  ;;  %v1684_v61 = vld [vmem:[#allocation10 + $0x20] sm:$0xff]  }
 0x224   :  { %v1501_v2 = vpop.f32.mrf.mxu1 }
 0x225   :  { %v501_v4 = vmax.f32 %v441_v0, 0.0  ;;  %v517_v8 = vpack.c.bf16 %v503_v1, %v502_v5  ;;  %v462_v12 = vadd.f32 %v1501_v2, %v1324_v58 }
 0x226   :  { %v453_v6 = vpop.f32.mrf.mxu1 }
 0x227   :  { %v516_v7 = vpack.c.bf16 %v501_v4, %v500_v3  ;;  %v454_v10 = vadd.f32 %v1324_v58, %v453_v6  ;;  %v506_v20 = vmax.f32 %v462_v12, 0.0 }
 0x228   :  { %v1502_v9 = vpop.f32.mrf.mxu1 }
 0x229   :  { %v465_v11 = vadd.f32 %v1502_v9, %v1324_v58  ;;  %1527 = vmatprep.mubr.bf16.mxu0 %v516_v7  ;;  %v504_v18 = vmax.f32 %v454_v10, 0.0 }
 0x22a   :  { %v456_v13 = vpop.f32.mrf.mxu1  ;;  %1528 = vmatmul.mubr.bf16.vlgmr.msra.gmra.mxu0 %v517_v8 }
 0x22b   :  { %v457_v14 = vadd.f32 %v1324_v58, %v456_v13  ;;  %v507_v15 = vmax.f32 %v465_v11, 0.0  ;;  %1576 = vmatpush3.bf16.msra.mxu0 %v1681_v57 }
 0x22c   :  { %v1505_v17 = vpop.f32.mrf.mxu1  ;;  %1577 = vmatprep.subr.bf16.mxu0 %v1682_v59 }
 0x22d   :  { %v505_v19 = vmax.f32 %v457_v14, 0.0  ;;  %v519_v23 = vpack.c.bf16 %v507_v15, %v506_v20  ;;  %v478_v27 = vadd.f32 %v1505_v17, %v1324_v58 }
 0x22e   :  { %v469_v21 = vpop.f32.mrf.mxu1 }
 0x22f   :  { %v518_v22 = vpack.c.bf16 %v505_v19, %v504_v18  ;;  %v470_v25 = vadd.f32 %v1324_v58, %v469_v21  ;;  %v510_v34 = vmax.f32 %v478_v27, 0.0  ;;  %1578 = vmatpush3.bf16.msra.mxu0 %v1682_v59 }
 0x230   :  { %v1506_v24 = vpop.f32.mrf.mxu1  ;;  %1579 = vmatprep.subr.bf16.mxu0 %v1683_v60 }
 0x231   :  { %v481_v26 = vadd.f32 %v1506_v24, %v1324_v58  ;;  %1531 = vmatprep.mubr.bf16.mxu0 %v518_v22  ;;  %v508_v32 = vmax.f32 %v470_v25, 0.0  ;;  %v1687_v24 = vld [vmem:[#allocation10 + $0x8] sm:$0xff]   ;;  %v1688_v25 = vld [vmem:[#allocation10] sm:$0xff]  }
 0x232   :  { %v472_v28 = vpop.f32.mrf.mxu1  ;;  %1532 = vmatmul.mubr.bf16.gmra.mxu0 %v519_v23  ;;  %v1686_v23 = vld [vmem:[#allocation10 + $0x10] sm:$0xff]  }
 0x233   :  { %v473_v29 = vadd.f32 %v1324_v58, %v472_v28  ;;  %v511_v30 = vmax.f32 %v481_v26, 0.0  ;;  %1580 = vmatpush3.bf16.msra.mxu0 %v1683_v60  ;;  %v1341_v28 = vld [vmem:[%s2146_s5] ss:$0 sm:$0xff] }
 0x234   :  { %v1509_v31 = vpop.f32.mrf.mxu1  ;;  %1581 = vmatprep.subr.bf16.mxu0 %v1684_v61 }
 0x235   :  { %v509_v33 = vmax.f32 %v473_v29, 0.0  ;;  %v521_v37 = vpack.c.bf16 %v511_v30, %v510_v34  ;;  %v494_v41 = vadd.f32 %v1509_v31, %v1324_v58 }
 0x236   :  { %v485_v35 = vpop.f32.mrf.mxu1 }
 0x237   :  { %v520_v36 = vpack.c.bf16 %v509_v33, %v508_v32  ;;  %v486_v39 = vadd.f32 %v1324_v58, %v485_v35  ;;  %v514_v54 = vmax.f32 %v494_v41, 0.0  ;;  %1582 = vmatpush3.bf16.msra.mxu0 %v1684_v61 }
 0x238   :  { %v1510_v38 = vpop.f32.mrf.mxu1 }
 0x239   :  { %v497_v40 = vadd.f32 %v1510_v38, %v1324_v58  ;;  %1535 = vmatprep.mubr.bf16.mxu0 %v520_v36  ;;  %v512_v45 = vmax.f32 %v486_v39, 0.0 }
 0x23a   :  { %v488_v42 = vpop.f32.mrf.mxu1  ;;  %1536 = vmatmul.mubr.bf16.gmra.mxu0 %v521_v37 }
 0x23b   :  { %v489_v43 = vadd.f32 %v1324_v58, %v488_v42  ;;  %v515_v44 = vmax.f32 %v497_v40, 0.0  ;;  %v1685_v58 = vld [vmem:[#allocation10 + $0x18] sm:$0xff]  }
 0x23c   :  { %1583 = vmatprep.subr.bf16.mxu0 %v1685_v58 }
 0x23d   :  { %v513_v53 = vmax.f32 %v489_v43, 0.0  ;;  %v523_v56 = vpack.c.bf16 %v515_v44, %v514_v54  ;;  %1584 = vmatpush3.bf16.msra.mxu0 %v1685_v58 }
 0x23e   :  { %1585 = vmatprep.subr.bf16.mxu0 %v1686_v23 }
 0x23f   :  { %v522_v55 = vpack.c.bf16 %v513_v53, %v512_v45 }
 0x241   :  { %1539 = vmatprep.mubr.bf16.mxu0 %v522_v55  ;;  %1586 = vmatpush3.bf16.msra.mxu0 %v1686_v23 }
 0x242   :  { %1540 = vmatmul.mubr.bf16.gmra.mxu0 %v523_v56  ;;  %1587 = vmatprep.subr.bf16.mxu0 %v1687_v24 }
 0x245   :  { %1588 = vmatpush3.bf16.msra.mxu0 %v1687_v24 }
 0x246   :  { %1589 = vmatprep.subr.bf16.mxu0 %v1688_v25 }
 0x249   :  { %1590 = vmatpush3.bf16.msra.mxu0 %v1688_v25 }
 0x2ea   :  { %v1529_v62 = vpop.f32.mrf.mxu0 }
 0x2ec   :  { %v622_v63 = vpop.f32.mrf.mxu0 }
 0x2ee   :  { %v1530_v0 = vpop.f32.mrf.mxu0 }
 0x2ef   :  { %v686_v21 = vpack.c.bf16 %v1530_v0, %v1529_v62 }
 0x2f0   :  { %v625_v1 = vpop.f32.mrf.mxu0 }
 0x2f1   :  { %v685_v22 = vpack.c.bf16 %v625_v1, %v622_v63 }
 0x2f2   :  { %v1533_v2 = vpop.f32.mrf.mxu0 }
 0x2f4   :  { %v638_v3 = vpop.f32.mrf.mxu0 }
 0x2f6   :  { %v1534_v4 = vpop.f32.mrf.mxu0 }
 0x2f7   :  { %v688_v19 = vpack.c.bf16 %v1534_v4, %v1533_v2 }
 0x2f8   :  { %v641_v5 = vpop.f32.mrf.mxu0 }
 0x2f9   :  { %v687_v20 = vpack.c.bf16 %v641_v5, %v638_v3 }
 0x2fa   :  { %v1537_v6 = vpop.f32.mrf.mxu0 }
 0x2fc   :  { %v654_v7 = vpop.f32.mrf.mxu0 }
 0x2fe   :  { %v1538_v8 = vpop.f32.mrf.mxu0 }
 0x2ff   :  { %v690_v17 = vpack.c.bf16 %v1538_v8, %v1537_v6 }
 0x300   :  { %v657_v9 = vpop.f32.mrf.mxu0 }
 0x301   :  { %v689_v18 = vpack.c.bf16 %v657_v9, %v654_v7 }
 0x302   :  { %v1541_v10 = vpop.f32.mrf.mxu0 }
 0x304   :  { %v670_v11 = vpop.f32.mrf.mxu0 }
 0x306   :  { %v1542_v12 = vpop.f32.mrf.mxu0 }
 0x307   :  { %v692_v13 = vpack.c.bf16 %v1542_v12, %v1541_v10 }
 0x308   :  { %v673_v14 = vpop.f32.mrf.mxu0 }
 0x309   :  { %v691_v15 = vpack.c.bf16 %v673_v14, %v670_v11  ;;  %1543 = vmatprep.subr.bf16.mxu1 %v692_v13 }
 0x30a   :  { %1544 = vmatpush3.bf16.msra.mxu1 %v692_v13 }
 0x30b   :  { %1545 = vmatprep.subr.bf16.mxu1 %v691_v15 }
 0x30e   :  { %1546 = vmatpush3.bf16.msra.mxu1 %v691_v15 }
 0x30f   :  { %1547 = vmatprep.subr.bf16.mxu1 %v690_v17 }
 0x312   :  { %1548 = vmatpush3.bf16.msra.mxu1 %v690_v17 }
 0x313   :  { %1549 = vmatprep.subr.bf16.mxu1 %v689_v18 }
 0x316   :  { %1550 = vmatpush3.bf16.msra.mxu1 %v689_v18 }
 0x317   :  { %1551 = vmatprep.subr.bf16.mxu1 %v688_v19 }
 0x31a   :  { %1552 = vmatpush3.bf16.msra.mxu1 %v688_v19 }
 0x31b   :  { %1553 = vmatprep.subr.bf16.mxu1 %v687_v20 }
 0x31e   :  { %1554 = vmatpush3.bf16.msra.mxu1 %v687_v20 }
 0x31f   :  { %1555 = vmatprep.subr.bf16.mxu1 %v686_v21 }
 0x322   :  { %1556 = vmatpush3.bf16.msra.mxu1 %v686_v21 }
 0x323   :  { %1557 = vmatprep.subr.bf16.mxu1 %v685_v22 }
 0x326   :  { %1558 = vmatpush3.bf16.msra.mxu1 %v685_v22 }
 0x329   :  { %1560 = vmatmul.mubr.bf16.vlgmr.msra.gmra.mxu1 %v1969_v46 }
 0x32a   :  { %1563 = vmatprep.mubr.bf16.mxu1 %v1971_v47 }
 0x331   :  { %1564 = vmatmul.mubr.bf16.gmra.mxu1 %v1975_v48 }
 0x332   :  { %1567 = vmatprep.mubr.bf16.mxu1 %v1977_v49 }
 0x339   :  { %1568 = vmatmul.mubr.bf16.gmra.mxu1 %v1981_v50 }
 0x33a   :  { %1571 = vmatprep.mubr.bf16.mxu1 %v1983_v51 }
 0x341   :  { %1572 = vmatmul.mubr.bf16.gmra.mxu1 %v1987_v52 }
 0x342   :  { %1623 = vmatprep.mubr.bf16.mxu1 %v1966_v16 }
 0x3e9   :  { %v1561_v26 = vpop.f32.mrf.mxu1 }
 0x3ea   :  { %v743_v32 = vadd.f32 %v1561_v26, %v1341_v28 }
 0x3eb   :  { %v734_v27 = vpop.f32.mrf.mxu1 }
 0x3ec   :  { %v735_v30 = vadd.f32 %v1341_v28, %v734_v27  ;;  %v799_v38 = vmax.f32 %v743_v32, 0.0 }
 0x3ed   :  { %v1562_v29 = vpop.f32.mrf.mxu1 }
 0x3ee   :  { %v746_v31 = vadd.f32 %v1562_v29, %v1341_v28  ;;  %v797_v36 = vmax.f32 %v735_v30, 0.0 }
 0x3ef   :  { %v737_v16 = vpop.f32.mrf.mxu1 }
 0x3f0   :  { %v738_v33 = vadd.f32 %v1341_v28, %v737_v16  ;;  %v800_v34 = vmax.f32 %v746_v31, 0.0 }
 0x3f1   :  { %v1565_v35 = vpop.f32.mrf.mxu1 }
 0x3f2   :  { %v798_v37 = vmax.f32 %v738_v33, 0.0  ;;  %v814_v41 = vpack.c.bf16 %v800_v34, %v799_v38  ;;  %v759_v45 = vadd.f32 %v1565_v35, %v1341_v28 }
 0x3f3   :  { %v750_v39 = vpop.f32.mrf.mxu1 }
 0x3f4   :  { %v813_v40 = vpack.c.bf16 %v798_v37, %v797_v36  ;;  %v751_v43 = vadd.f32 %v1341_v28, %v750_v39  ;;  %v803_v60 = vmax.f32 %v759_v45, 0.0 }
 0x3f5   :  { %v1566_v42 = vpop.f32.mrf.mxu1 }
 0x3f6   :  { %v762_v44 = vadd.f32 %v1566_v42, %v1341_v28  ;;  %1591 = vmatprep.mubr.bf16.mxu0 %v813_v40  ;;  %v801_v57 = vmax.f32 %v751_v43, 0.0 }
 0x3f7   :  { %v753_v53 = vpop.f32.mrf.mxu1  ;;  %1592 = vmatmul.mubr.bf16.vlgmr.msra.gmra.mxu0 %v814_v41 }
 0x3f8   :  { %v754_v54 = vadd.f32 %v1341_v28, %v753_v53  ;;  %v804_v55 = vmax.f32 %v762_v44, 0.0 }
 0x3f9   :  { %v1569_v56 = vpop.f32.mrf.mxu1 }
 0x3fa   :  { %v802_v59 = vmax.f32 %v754_v54, 0.0  ;;  %v816_v62 = vpack.c.bf16 %v804_v55, %v803_v60  ;;  %v775_v2 = vadd.f32 %v1569_v56, %v1341_v28  ;;  %v1094_v56 = vlaneseq }
 0x3fb   :  { %v766_v61 = vpop.f32.mrf.mxu1 }
 0x3fc   :  { %v815_v58 = vpack.c.bf16 %v802_v59, %v801_v57  ;;  %v767_v0 = vadd.f32 %v1341_v28, %v766_v61  ;;  %v807_v9 = vmax.f32 %v775_v2, 0.0  ;;  %v2012_v57 = vand.u32 127, %v1094_v56  ;;  %v1350_v59 = vld [vmem:[%s2148_s7] ss:$0 sm:$0xff]  ;;  %s1888_s7 = smov [#allocation11]  }
 0x3fd   :  { %v1570_v63 = vpop.f32.mrf.mxu1  ;;  %s1294_s9 = sshll.u32 %s1888_s7, 4  ;;  %s1295_s9 = int_to_ptr.vmem [resolvable:$true] %s1294_s9 }
 0x3fe   :  { %v778_v1 = vadd.f32 %v1570_v63, %v1341_v28  ;;  %1595 = vmatprep.mubr.bf16.mxu0 %v815_v58  ;;  %v805_v7 = vmax.f32 %v767_v0, 0.0  ;;  %vm1096_vm0 = vcmp.lt.s32.totalorder %v2012_v57, 4  ;;  %s1853_s10 = scalar_lea.vmem %s1295_s9, 2048  ;;  %p1858_p12 = scmp.lt.s32.totalorder %s1295_s9, %s1295_s9 }
 0x3ff   :  { %v769_v3 = vpop.f32.mrf.mxu1  ;;  %1596 = vmatmul.mubr.bf16.gmra.mxu0 %v816_v62  ;;  %p1854_p11 = scmp.ne.s32.totalorder %s1295_s9, %s1853_s10  ;;  %p1859_p13 = scmp.lt.s32.totalorder %s1853_s10, %s1853_s10 }
 0x400   :  { %v770_v4 = vadd.f32 %v1341_v28, %v769_v3  ;;  %v808_v5 = vmax.f32 %v778_v1, 0.0 }
 0x401   :  { %v1573_v6 = vpop.f32.mrf.mxu1  ;;  %p1860_p0 = por %p1859_p13, %p1858_p12 }
 0x402   :  { %v806_v8 = vmax.f32 %v770_v4, 0.0  ;;  %v818_v12 = vpack.c.bf16 %v808_v5, %v807_v9  ;;  %v791_v17 = vadd.f32 %v1573_v6, %v1341_v28 }
 0x403   :  { %v782_v10 = vpop.f32.mrf.mxu1  ;;  %p1861_p1 = pnand %p1860_p0, %p1854_p11 }
 0x404   :  { %v817_v11 = vpack.c.bf16 %v806_v8, %v805_v7  ;;  %v783_v14 = vadd.f32 %v1341_v28, %v782_v10  ;;  %v811_v23 = vmax.f32 %v791_v17, 0.0 }
 0x405   :  { %v1574_v13 = vpop.f32.mrf.mxu1 }
 0x406   :  { %v794_v15 = vadd.f32 %v1574_v13, %v1341_v28  ;;  %1599 = vmatprep.mubr.bf16.mxu0 %v817_v11  ;;  %v809_v21 = vmax.f32 %v783_v14, 0.0 }
 0x407   :  { %v785_v18 = vpop.f32.mrf.mxu1  ;;  %1600 = vmatmul.mubr.bf16.gmra.mxu0 %v818_v12 }
 0x408   :  { %v786_v19 = vadd.f32 %v1341_v28, %v785_v18  ;;  %v812_v20 = vmax.f32 %v794_v15, 0.0 }
 0x40a   :  { %v810_v22 = vmax.f32 %v786_v19, 0.0  ;;  %v820_v25 = vpack.c.bf16 %v812_v20, %v811_v23 }
 0x40c   :  { %v819_v24 = vpack.c.bf16 %v810_v22, %v809_v21 }
 0x40e   :  { %1603 = vmatprep.mubr.bf16.mxu0 %v819_v24 }
 0x40f   :  { %1604 = vmatmul.mubr.bf16.gmra.mxu0 %v820_v25 }
 0x4b7   :  { %v1593_v26 = vpop.f32.mrf.mxu0 }
 0x4b9   :  { %v919_v27 = vpop.f32.mrf.mxu0 }
 0x4bb   :  { %v1594_v29 = vpop.f32.mrf.mxu0 }
 0x4bc   :  { %v983_v54 = vpack.c.bf16 %v1594_v29, %v1593_v26 }
 0x4bd   :  { %v922_v30 = vpop.f32.mrf.mxu0 }
 0x4be   :  { %v982_v55 = vpack.c.bf16 %v922_v30, %v919_v27 }
 0x4bf   :  { %v1597_v31 = vpop.f32.mrf.mxu0 }
 0x4c1   :  { %v935_v32 = vpop.f32.mrf.mxu0 }
 0x4c3   :  { %v1598_v16 = vpop.f32.mrf.mxu0 }
 0x4c4   :  { %v985_v45 = vpack.c.bf16 %v1598_v16, %v1597_v31 }
 0x4c5   :  { %v938_v33 = vpop.f32.mrf.mxu0 }
 0x4c6   :  { %v984_v53 = vpack.c.bf16 %v938_v33, %v935_v32 }
 0x4c7   :  { %v1601_v34 = vpop.f32.mrf.mxu0 }
 0x4c9   :  { %v951_v35 = vpop.f32.mrf.mxu0 }
 0x4cb   :  { %v1602_v36 = vpop.f32.mrf.mxu0 }
 0x4cc   :  { %v987_v43 = vpack.c.bf16 %v1602_v36, %v1601_v34 }
 0x4cd   :  { %v954_v28 = vpop.f32.mrf.mxu0 }
 0x4ce   :  { %v986_v44 = vpack.c.bf16 %v954_v28, %v951_v35 }
 0x4cf   :  { %v1605_v37 = vpop.f32.mrf.mxu0 }
 0x4d1   :  { %v967_v38 = vpop.f32.mrf.mxu0 }
 0x4d3   :  { %v1606_v39 = vpop.f32.mrf.mxu0 }
 0x4d4   :  { %v989_v40 = vpack.c.bf16 %v1606_v39, %v1605_v37 }
 0x4d5   :  { %v970_v41 = vpop.f32.mrf.mxu0 }
 0x4d6   :  { %v988_v42 = vpack.c.bf16 %v970_v41, %v967_v38  ;;  %1607 = vmatprep.subr.bf16.mxu1 %v989_v40 }
 0x4d7   :  { %1608 = vmatpush3.bf16.msra.mxu1 %v989_v40 }
 0x4d8   :  { %1609 = vmatprep.subr.bf16.mxu1 %v988_v42 }
 0x4db   :  { %1610 = vmatpush3.bf16.msra.mxu1 %v988_v42 }
 0x4dc   :  { %1611 = vmatprep.subr.bf16.mxu1 %v987_v43 }
 0x4df   :  { %1612 = vmatpush3.bf16.msra.mxu1 %v987_v43 }
 0x4e0   :  { %1613 = vmatprep.subr.bf16.mxu1 %v986_v44 }
 0x4e3   :  { %1614 = vmatpush3.bf16.msra.mxu1 %v986_v44 }
 0x4e4   :  { %1615 = vmatprep.subr.bf16.mxu1 %v985_v45 }
 0x4e7   :  { %1616 = vmatpush3.bf16.msra.mxu1 %v985_v45 }
 0x4e8   :  { %1617 = vmatprep.subr.bf16.mxu1 %v984_v53 }
 0x4eb   :  { %1618 = vmatpush3.bf16.msra.mxu1 %v984_v53 }
 0x4ec   :  { %1619 = vmatprep.subr.bf16.mxu1 %v983_v54 }
 0x4ef   :  { %1620 = vmatpush3.bf16.msra.mxu1 %v983_v54 }
 0x4f0   :  { %1621 = vmatprep.subr.bf16.mxu1 %v982_v55 }
 0x4f3   :  { %1622 = vmatpush3.bf16.msra.mxu1 %v982_v55 }
 0x4f6   :  { %1624 = vmatmul.mubr.bf16.vlgmr.msra.gmra.mxu1 %v1969_v46 }
 0x4f7   :  { %1627 = vmatprep.mubr.bf16.mxu1 %v1971_v47 }
 0x4fe   :  { %1628 = vmatmul.mubr.bf16.gmra.mxu1 %v1975_v48 }
 0x4ff   :  { %1631 = vmatprep.mubr.bf16.mxu1 %v1977_v49 }
 0x506   :  { %1632 = vmatmul.mubr.bf16.gmra.mxu1 %v1981_v50 }
 0x507   :  { %1635 = vmatprep.mubr.bf16.mxu1 %v1983_v51 }
 0x50e   :  { %1636 = vmatmul.mubr.bf16.gmra.mxu1 %v1987_v52 }
 0x5b6   :  { %v1625_v46 = vpop.f32.mrf.mxu1 }
 0x5b7   :  { %v1040_v47 = vadd.f32 %v1625_v46, %v1350_v59 }
 0x5b8   :  { %v1031_v48 = vpop.f32.mrf.mxu1 }
 0x5b9   :  { %v1032_v60 = vadd.f32 %v1350_v59, %v1031_v48  ;;  %v1099_v49 = vsel %vm1096_vm0, %v1040_v47, -1e+30 }
 0x5ba   :  { %1117 = vmax.xlane.f32.xlu1 %v1099_v49  ;;  %v1626_v50 = vpop.f32.mrf.mxu1 }
 0x5bb   :  { %v1043_v51 = vadd.f32 %v1626_v50, %v1350_v59  ;;  %v1097_v52 = vsel %vm1096_vm0, %v1032_v60, -1e+30 }
 0x5bc   :  { %v1034_v61 = vpop.f32.mrf.mxu1  ;;  %1113 = vmax.xlane.f32.xlu0 %v1097_v52 }
 0x5bd   :  { %v1035_v58 = vadd.f32 %v1350_v59, %v1034_v61  ;;  %v1100_v62 = vsel %vm1096_vm0, %v1043_v51, -1e+30 }
 0x5be   :  { %1119 = vmax.xlane.f32.xlu1 %v1100_v62  ;;  %v1629_v63 = vpop.f32.mrf.mxu1 }
 0x5bf   :  { %v1056_v0 = vadd.f32 %v1629_v63, %v1350_v59  ;;  %v1098_v1 = vsel %vm1096_vm0, %v1035_v58, -1e+30 }
 0x5c0   :  { %v1047_v2 = vpop.f32.mrf.mxu1  ;;  %1115 = vmax.xlane.f32.xlu0 %v1098_v1 }
 0x5c1   :  { %v1048_v4 = vadd.f32 %v1350_v59, %v1047_v2  ;;  %v1103_v6 = vsel %vm1096_vm0, %v1056_v0, -1e+30 }
 0x5c2   :  { %v1630_v3 = vpop.f32.mrf.mxu1 }
 0x5c3   :  { %v1059_v5 = vadd.f32 %v1630_v3, %v1350_v59  ;;  %v1101_v12 = vsel %vm1096_vm0, %v1048_v4, -1e+30 }
 0x5c4   :  { %v1050_v7 = vpop.f32.mrf.mxu1  ;;  %1125 = vmax.xlane.f32.xlu0 %v1103_v6 }
 0x5c5   :  { %v1051_v8 = vadd.f32 %v1350_v59, %v1050_v7  ;;  %v1104_v9 = vsel %vm1096_vm0, %v1059_v5, -1e+30 }
 0x5c6   :  { %1127 = vmax.xlane.f32.xlu1 %v1104_v9  ;;  %v1633_v10 = vpop.f32.mrf.mxu1 }
 0x5c7   :  { %v1072_v11 = vadd.f32 %v1633_v10, %v1350_v59  ;;  %v1102_v14 = vsel %vm1096_vm0, %v1051_v8, -1e+30 }
 0x5c8   :  { %v1063_v13 = vpop.f32.mrf.mxu1  ;;  %1121 = vmax.xlane.f32.xlu0 %v1101_v12 }
 0x5c9   :  { %v1064_v17 = vadd.f32 %v1350_v59, %v1063_v13  ;;  %v1107_v19 = vsel %vm1096_vm0, %v1072_v11, -1e+30 }
 0x5ca   :  { %v1634_v15 = vpop.f32.mrf.mxu1  ;;  %1123 = vmax.xlane.f32.xlu1 %v1102_v14 }
 0x5cb   :  { %v1075_v18 = vadd.f32 %v1634_v15, %v1350_v59  ;;  %v2040_v24 = vsel %vm1096_vm0, %v1064_v17, -1e+30 }
 0x5cc   :  { %v1066_v20 = vpop.f32.mrf.mxu1  ;;  %1133 = vmax.xlane.f32.xlu0 %v1107_v19 }
 0x5cd   :  { %v1067_v21 = vadd.f32 %v1350_v59, %v1066_v20  ;;  %v1108_v22 = vsel %vm1096_vm0, %v1075_v18, -1e+30 }
 0x5ce   :  { %v1637_v23 = vpop.f32.mrf.mxu1  ;;  %1135 = vmax.xlane.f32.xlu1 %v1108_v22 }
 0x5cf   :  { %v2045_v27 = vsel %vm1096_vm0, %v1067_v21, -1e+30  ;;  %v1088_v30 = vadd.f32 %v1637_v23, %v1350_v59 }
 0x5d0   :  { %v1079_v25 = vpop.f32.mrf.mxu1  ;;  %1129 = vmax.xlane.f32.xlu0 %v2040_v24 }
 0x5d1   :  { %v1080_v26 = vadd.f32 %v1350_v59, %v1079_v25  ;;  %v2059_v35 = vsel %vm1096_vm0, %v1088_v30, -1e+30 }
 0x5d2   :  { %v1638_v29 = vpop.f32.mrf.mxu1  ;;  %1131 = vmax.xlane.f32.xlu1 %v2045_v27 }
 0x5d3   :  { %v2050_v31 = vsel %vm1096_vm0, %v1080_v26, -1e+30  ;;  %v1091_v33 = vadd.f32 %v1638_v29, %v1350_v59 }
 0x5d4   :  { %v1082_v32 = vpop.f32.mrf.mxu1  ;;  %1137 = vmax.xlane.f32.xlu0 %v2050_v31 }
 0x5d5   :  { %v1083_v16 = vadd.f32 %v1350_v59, %v1082_v32  ;;  %v2065_v36 = vsel %vm1096_vm0, %v1091_v33, -1e+30 }
 0x5d7   :  { %v2055_v34 = vsel %vm1096_vm0, %v1083_v16, -1e+30 }
 0x5d8   :  { %1139 = vmax.xlane.f32.xlu1 %v2055_v34  ;;  %1141 = vmax.xlane.f32.xlu0 %v2059_v35 }
 0x5dc   :  { %1143 = vmax.xlane.f32.xlu1 %v2065_v36 }
 0x643   :  { %v1118_v28 = vpop.xlane.xlu1 %1117 }
 0x644   :  { %v2068_v37 = vsub.f32 %v1099_v49, %v1118_v28 }
 0x645   :  { %v1114_v38 = vpop.xlane.xlu0 %1113 }
 0x646   :  { %v1165_v39 = vmul.f32 1.442695, %v2068_v37  ;;  %v2071_v40 = vsub.f32 %v1097_v52, %v1114_v38 }
 0x647   :  { %v1120_v41 = vpop.xlane.xlu1 %1119 }
 0x648   :  { %1689 = vpow2.f32 %v1165_v39  ;;  %v1161_v42 = vmul.f32 1.442695, %v2071_v40  ;;  %v2074_v43 = vsub.f32 %v1100_v62, %v1120_v41 }
 0x649   :  { %v1116_v44 = vpop.xlane.xlu0 %1115 }
 0x64a   :  { %v1167_v45 = vmul.f32 1.442695, %v2074_v43  ;;  %v2077_v53 = vsub.f32 %v1098_v1, %v1116_v44  ;;  %1691 = vpow2.f32 %v1161_v42 }
 0x64c   :  { %1693 = vpow2.f32 %v1167_v45  ;;  %v1163_v54 = vmul.f32 1.442695, %v2077_v53 }
 0x64d   :  { %v1126_v55 = vpop.xlane.xlu0 %1125 }
 0x64e   :  { %v2080_v56 = vsub.f32 %v1103_v6, %v1126_v55  ;;  %1695 = vpow2.f32 %v1163_v54 }
 0x64f   :  { %v1128_v57 = vpop.xlane.xlu1 %1127 }
 0x650   :  { %v1173_v59 = vmul.f32 1.442695, %v2080_v56  ;;  %v2083_v46 = vsub.f32 %v1104_v9, %v1128_v57 }
 0x651   :  { %v1122_v47 = vpop.xlane.xlu0 %1121 }
 0x652   :  { %1697 = vpow2.f32 %v1173_v59  ;;  %v1175_v48 = vmul.f32 1.442695, %v2083_v46  ;;  %v2086_v60 = vsub.f32 %v1101_v12, %v1122_v47 }
 0x653   :  { %v1124_v49 = vpop.xlane.xlu1 %1123 }
 0x654   :  { %1699 = vpow2.f32 %v1175_v48  ;;  %v1169_v50 = vmul.f32 1.442695, %v2086_v60  ;;  %v2089_v51 = vsub.f32 %v1102_v14, %v1124_v49 }
 0x655   :  { %v1690_v52 = vpop.eup %1689  ;;  %v1134_v61 = vpop.xlane.xlu0 %1133 }
 0x656   :  { %1701 = vpow2.f32 %v1169_v50  ;;  %v1171_v58 = vmul.f32 1.442695, %v2089_v51  ;;  %v2092_v62 = vsub.f32 %v1107_v19, %v1134_v61  ;;  %1197 = vadd.xlane.f32.xlu0 %v1690_v52 }
 0x657   :  { %v1136_v63 = vpop.xlane.xlu1 %1135  ;;  %v1692_v0 = vpop.eup %1691 }
 0x658   :  { %1703 = vpow2.f32 %v1171_v58  ;;  %v1181_v1 = vmul.f32 1.442695, %v2092_v62  ;;  %v2095_v2 = vsub.f32 %v1108_v22, %v1136_v63 }
 0x659   :  { %v1694_v3 = vpop.eup %1693  ;;  %v1130_v4 = vpop.xlane.xlu0 %1129 }
 0x65a   :  { %1705 = vpow2.f32 %v1181_v1  ;;  %v1183_v5 = vmul.f32 1.442695, %v2095_v2  ;;  %v2099_v6 = vsub.f32 %v2040_v24, %v1130_v4  ;;  %1199 = vadd.xlane.f32.xlu1 %v1694_v3  ;;  %1193 = vadd.xlane.f32.xlu0 %v1692_v0 }
 0x65b   :  { %v1132_v7 = vpop.xlane.xlu1 %1131  ;;  %v1696_v10 = vpop.eup %1695 }
 0x65c   :  { %1707 = vpow2.f32 %v1183_v5  ;;  %v1177_v8 = vmul.f32 1.442695, %v2099_v6  ;;  %v2103_v9 = vsub.f32 %v2045_v27, %v1132_v7 }
 0x65d   :  { %v1138_v11 = vpop.xlane.xlu0 %1137 }
 0x65e   :  { %1709 = vpow2.f32 %v1177_v8  ;;  %v1179_v12 = vmul.f32 1.442695, %v2103_v9  ;;  %v2107_v13 = vsub.f32 %v2050_v31, %v1138_v11  ;;  %1195 = vadd.xlane.f32.xlu1 %v1696_v10 }
 0x65f   :  { %v1698_v14 = vpop.eup %1697 }
 0x660   :  { %1711 = vpow2.f32 %v1179_v12  ;;  %v1185_v15 = vmul.f32 1.442695, %v2107_v13  ;;  %1205 = vadd.xlane.f32.xlu0 %v1698_v14 }
 0x661   :  { %v1700_v17 = vpop.eup %1699  ;;  %v1140_v18 = vpop.xlane.xlu1 %1139 }
 0x662   :  { %v1142_v19 = vpop.xlane.xlu0 %1141  ;;  %1713 = vpow2.f32 %v1185_v15  ;;  %v2111_v20 = vsub.f32 %v2055_v34, %v1140_v18  ;;  %1207 = vadd.xlane.f32.xlu1 %v1700_v17 }
 0x663   :  { %v2114_v21 = vsub.f32 %v2059_v35, %v1142_v19  ;;  %v1702_v22 = vpop.eup %1701 }
 0x664   :  { %v1187_v23 = vmul.f32 1.442695, %v2111_v20  ;;  %1201 = vadd.xlane.f32.xlu0 %v1702_v22 }
 0x665   :  { %v1189_v24 = vmul.f32 1.442695, %v2114_v21  ;;  %v1704_v25 = vpop.eup %1703  ;;  %v1144_v26 = vpop.xlane.xlu1 %1143 }
 0x666   :  { %1715 = vpow2.f32 %v1187_v23  ;;  %v2119_v27 = vsub.f32 %v2065_v36, %v1144_v26  ;;  %1203 = vadd.xlane.f32.xlu1 %v1704_v25 }
 0x667   :  { %v1706_v29 = vpop.eup %1705  ;;  %1717 = vpow2.f32 %v1189_v24 }
 0x668   :  { %v1191_v30 = vmul.f32 1.442695, %v2119_v27  ;;  %1213 = vadd.xlane.f32.xlu0 %v1706_v29 }
 0x669   :  { %v1708_v31 = vpop.eup %1707 }
 0x66a   :  { %1719 = vpow2.f32 %v1191_v30  ;;  %1215 = vadd.xlane.f32.xlu1 %v1708_v31 }
 0x66b   :  { %v1710_v32 = vpop.eup %1709 }
 0x66c   :  { %1209 = vadd.xlane.f32.xlu0 %v1710_v32 }
 0x66d   :  { %v1712_v16 = vpop.eup %1711 }
 0x66e   :  { %1211 = vadd.xlane.f32.xlu1 %v1712_v16 }
 0x66f   :  { %v1714_v33 = vpop.eup %1713 }
 0x670   :  { %1217 = vadd.xlane.f32.xlu0 %v1714_v33 }
 0x673   :  { %v1716_v34 = vpop.eup %1715 }
 0x674   :  { %v1718_v35 = vpop.eup %1717  ;;  %1219 = vadd.xlane.f32.xlu1 %v1716_v34 }
 0x675   :  { %1221 = vadd.xlane.f32.xlu0 %v1718_v35 }
 0x677   :  { %v1720_v36 = vpop.eup %1719 }
 0x678   :  { %1223 = vadd.xlane.f32.xlu1 %v1720_v36 }
 0x6df   :  { %v1198_v28 = vpop.xlane.xlu0 %1197 }
 0x6e0   :  { %1721 = vlog2.f32 %v1198_v28 }
 0x6e3   :  { %v1200_v38 = vpop.xlane.xlu1 %1199  ;;  %v1194_v39 = vpop.xlane.xlu0 %1193 }
 0x6e4   :  { %1723 = vlog2.f32 %v1200_v38 }
 0x6e5   :  { %1725 = vlog2.f32 %v1194_v39 }
 0x6e7   :  { %v1196_v41 = vpop.xlane.xlu1 %1195 }
 0x6e8   :  { %1727 = vlog2.f32 %v1196_v41 }
 0x6e9   :  { %v1206_v42 = vpop.xlane.xlu0 %1205 }
 0x6ea   :  { %1729 = vlog2.f32 %v1206_v42 }
 0x6eb   :  { %v1208_v44 = vpop.xlane.xlu1 %1207 }
 0x6ec   :  { %1731 = vlog2.f32 %v1208_v44 }
 0x6ed   :  { %v1722_v45 = vpop.eup %1721  ;;  %v1202_v54 = vpop.xlane.xlu0 %1201 }
 0x6ee   :  { %v1230_v55 = vmul.f32 0.6931472, %v1722_v45  ;;  %1733 = vlog2.f32 %v1202_v54 }
 0x6ef   :  { %v1204_v57 = vpop.xlane.xlu1 %1203 }
 0x6f0   :  { %v1259_v59 = vsub.f32 %v2068_v37, %v1230_v55  ;;  %1735 = vlog2.f32 %v1204_v57 }
 0x6f1   :  { %v1724_v47 = vpop.eup %1723  ;;  %v1214_v48 = vpop.xlane.xlu0 %1213 }
 0x6f2   :  { %v1726_v49 = vpop.eup %1725  ;;  %1275 = vst [vmem:[#allocation11 + $0x10] sm:$0xff] %v1259_v59  ;;  %v1232_v50 = vmul.f32 0.6931472, %v1724_v47  ;;  %1737 = vlog2.f32 %v1214_v48 }
 0x6f3   :  { %v1226_v52 = vmul.f32 0.6931472, %v1726_v49  ;;  %v1216_v61 = vpop.xlane.xlu1 %1215 }
 0x6f4   :  { %v1260_v58 = vsub.f32 %v2074_v43, %v1232_v50  ;;  %1739 = vlog2.f32 %v1216_v61 }
 0x6f5   :  { %v1728_v63 = vpop.eup %1727  ;;  %v1257_v0 = vsub.f32 %v2071_v40, %v1226_v52  ;;  %v1210_v1 = vpop.xlane.xlu0 %1209 }
 0x6f6   :  { %1276 = vst [vmem:[#allocation11 + $0x18] sm:$0xff] %v1260_v58  ;;  %v1228_v3 = vmul.f32 0.6931472, %v1728_v63  ;;  %1741 = vlog2.f32 %v1210_v1 }
 0x6f7   :  { %v1730_v37 = vpop.eup %1729  ;;  %1273 = vst [vmem:[#allocation11] sm:$0xff] %v1257_v0  ;;  %v1212_v4 = vpop.xlane.xlu1 %1211 }
 0x6f8   :  { %v1258_v5 = vsub.f32 %v2077_v53, %v1228_v3  ;;  %v1238_v7 = vmul.f32 0.6931472, %v1730_v37  ;;  %1743 = vlog2.f32 %v1212_v4 }
 0x6f9   :  { %v1732_v8 = vpop.eup %1731  ;;  %v1218_v10 = vpop.xlane.xlu0 %1217 }
 0x6fa   :  { %1274 = vst [vmem:[#allocation11 + $0x8] sm:$0xff] %v1258_v5  ;;  %v1263_v43 = vsub.f32 %v2080_v56, %v1238_v7  ;;  %v1240_v11 = vmul.f32 0.6931472, %v1732_v8  ;;  %1745 = vlog2.f32 %v1218_v10 }
 0x6fb   :  { %v1734_v12 = vpop.eup %1733 }
 0x6fc   :  { %1279 = vst [vmem:[#allocation11 + $0x30] sm:$0xff] %v1263_v43  ;;  %v1264_v40 = vsub.f32 %v2083_v46, %v1240_v11  ;;  %v1234_v14 = vmul.f32 0.6931472, %v1734_v12 }
 0x6fd   :  { %v1736_v15 = vpop.eup %1735  ;;  %v1220_v17 = vpop.xlane.xlu1 %1219 }
 0x6fe   :  { %1280 = vst [vmem:[#allocation11 + $0x38] sm:$0xff] %v1264_v40  ;;  %v1261_v18 = vsub.f32 %v2086_v60, %v1234_v14  ;;  %v1236_v53 = vmul.f32 0.6931472, %v1736_v15  ;;  %1747 = vlog2.f32 %v1220_v17  ;;  %v1222_v19 = vpop.xlane.xlu0 %1221 }
 0x6ff   :  { %v1738_v22 = vpop.eup %1737  ;;  %1749 = vlog2.f32 %v1222_v19 }
 0x700   :  { %1277 = vst [vmem:[#allocation11 + $0x20] sm:$0xff] %v1261_v18  ;;  %v1262_v56 = vsub.f32 %v2089_v51, %v1236_v53  ;;  %v1246_v23 = vmul.f32 0.6931472, %v1738_v22 }
 0x701   :  { %v1740_v24 = vpop.eup %1739  ;;  %v1224_v25 = vpop.xlane.xlu1 %1223 }
 0x702   :  { %1278 = vst [vmem:[#allocation11 + $0x28] sm:$0xff] %v1262_v56  ;;  %v1267_v46 = vsub.f32 %v2092_v62, %v1246_v23  ;;  %v1248_v26 = vmul.f32 0.6931472, %v1740_v24  ;;  %1751 = vlog2.f32 %v1224_v25 }
 0x703   :  { %v1742_v29 = vpop.eup %1741 }
 0x704   :  { %1283 = vst [vmem:[#allocation11 + $0x50] sm:$0xff] %v1267_v46  ;;  %v1268_v60 = vsub.f32 %v2095_v2, %v1248_v26  ;;  %v1242_v30 = vmul.f32 0.6931472, %v1742_v29 }
 0x705   :  { %v1744_v31 = vpop.eup %1743 }
 0x706   :  { %1284 = vst [vmem:[#allocation11 + $0x58] sm:$0xff] %v1268_v60  ;;  %v1265_v32 = vsub.f32 %v2099_v6, %v1242_v30  ;;  %v1244_v16 = vmul.f32 0.6931472, %v1744_v31 }
 0x707   :  { %v1746_v33 = vpop.eup %1745 }
 0x708   :  { %1281 = vst [vmem:[#allocation11 + $0x40] sm:$0xff] %v1265_v32  ;;  %v1266_v51 = vsub.f32 %v2103_v9, %v1244_v16  ;;  %v1250_v34 = vmul.f32 0.6931472, %v1746_v33 }
 0x70a   :  { %1282 = vst [vmem:[#allocation11 + $0x48] sm:$0xff] %v1266_v51  ;;  %v1269_v62 = vsub.f32 %v2107_v13, %v1250_v34 }
 0x70b   :  { %v1748_v35 = vpop.eup %1747 }
 0x70c   :  { %v1750_v36 = vpop.eup %1749  ;;  %1285 = vst [vmem:[#allocation11 + $0x60] sm:$0xff] %v1269_v62  ;;  %v1252_v28 = vmul.f32 0.6931472, %v1748_v35 }
 0x70d   :  { %v1254_v38 = vmul.f32 0.6931472, %v1750_v36 }
 0x70e   :  { %v1270_v2 = vsub.f32 %v2111_v20, %v1252_v28 }
 0x70f   :  { %v1752_v39 = vpop.eup %1751  ;;  %v1271_v41 = vsub.f32 %v2114_v21, %v1254_v38 }
 0x710   :  { %1286 = vst [vmem:[#allocation11 + $0x68] sm:$0xff] %v1270_v2  ;;  %v1256_v6 = vmul.f32 0.6931472, %v1752_v39 }
 0x711   :  { %1287 = vst [vmem:[#allocation11 + $0x70] sm:$0xff] %v1271_v41 }
 0x712   :  { %v1272_v9 = vsub.f32 %v2119_v27, %v1256_v6 }
 0x714   :  { %1288 = vst [vmem:[#allocation11 + $0x78] sm:$0xff] %v1272_v9 }
 0x715   :  { %1864 = shalt.err (!%p1861_p1)
}
 0x716   :  { %s1889_s11 = smov 128   ;;  %s1890_s12 = smov 8  }
 0x717   :  { %1300 = dma.vmem_to_hbm [thread:$0]  %s1295_s9, 2048, %s2149_s8, [#allocation4], %s1889_s11, %s1889_s11, %s1890_s12  }
 0x718   :  { %1879 = dma.done.wait [#allocation4], 2048  }
 0x719   :  { %1880 = vsyncadd [#allocation4], 4294965248 }
 0x71a   :  { %1304 = vsyncpa [#allocation3], 1 }
 0x71b   :  { %1305 = vsyncpa [#allocation6], 1 }
 0x71c   :  { %1306 = vsyncpa [#allocation9], 1 }
 0x71d   :  { %1307 = vsyncpa [#allocation4], 1 }

</bundles_post_ra>
